<compile_context>
chip_gen: v6e
topology: v6e:2x2x1
jax: 0.10.0
libtpu: 0.0.40
codegen_flags: <defaults>
</compile_context>

<pallas_src>
import functools
import math

import jax
import jax.numpy as jnp
import numpy as np
from jax.experimental import pallas as pl
from jax.experimental.pallas import tpu as pltpu


def _bigbird_attn_kernel(H, dk, mxu_dtype, approx_recip,
                         qx_ref, kx_ref, vx_ref,
                         wqkv_ref, bqkv_ref, wo_ref, bo_ref, out_ref):
    Bt, L, C = qx_ref.shape
    HD = H * dk
    Cp = out_ref.shape[-1]            # lane-padded output width (mult. of 128)

    # ---- fused QKV projection ------------------------------------------------
    # Stack the q/k/v activation rows and run ONE (3*Bt*L, C) @ (C, 3*HD)
    # matmul against the fused weight (much better MXU fill than 3x(M=8,N=32)).
    xq = qx_ref[...].reshape(Bt * L, C)
    xk = kx_ref[...].reshape(Bt * L, C)
    xv = vx_ref[...].reshape(Bt * L, C)
    x_all = jnp.concatenate([xq, xk, xv], axis=0)                  # (3*Bt*L, C)
    qkv = jnp.dot(x_all.astype(mxu_dtype), wqkv_ref[...].astype(mxu_dtype),
                  preferred_element_type=jnp.float32) + bqkv_ref[...]
    n = Bt * L
    # q rows read the WQ columns, k rows the WK columns, v rows the WV columns.
    # Fold 1/sqrt(dk) into q ONCE (instead of per-head (L,L) multiplies).
    q2 = qkv[0 * n:1 * n, 0 * HD:1 * HD] * (1.0 / math.sqrt(dk))
    k2 = qkv[1 * n:2 * n, 1 * HD:2 * HD]
    v2 = qkv[2 * n:3 * n, 2 * HD:3 * HD]

    # ---- BigBird pattern actually produced by the PyTorch code (the "random
    # block" assignment there is a no-op).  Grid-invariant: with the collapsed
    # grid this is computed exactly once per pallas_call. -----------------------
    row = jax.lax.broadcasted_iota(jnp.int32, (L, L), 0)
    col = jax.lax.broadcasted_iota(jnp.int32, (L, L), 1)
    pattern = ((row == 0) | (row == L - 1) | (col == 0) | (col == L - 1)
               | (jnp.abs(row - col) <= 1))

    # ---- attention, one batch element at a time (static unroll, Bt small) ----
    z_rows = []
    for b in range(Bt):
        qb = q2[b * L:(b + 1) * L].reshape(L, H, dk).astype(mxu_dtype)
        kb = k2[b * L:(b + 1) * L].reshape(L, H, dk).astype(mxu_dtype)
        vb = v2[b * L:(b + 1) * L].reshape(L, H, dk).astype(mxu_dtype)

        # Head-batched QK^T written on the natural (L, H, dk) layout; no
        # explicit transposes in the kernel — Mosaic picks the layout.
        s = jnp.einsum('qhd,khd->hqk', qb, kb,
                       preferred_element_type=jnp.float32)          # (H, L, L)
        # Un-selected entries stay exactly 0 (NOT -inf) and still enter the
        # softmax, matching the reference.
        s = jnp.where(pattern[None, :, :], s, 0.0)

        # Numerically stable softmax, kept in f32 even on the bf16 MXU path.
        s = s - jnp.max(s, axis=-1, keepdims=True)
        e = jnp.exp(s)
        denom = jnp.sum(e, axis=-1, keepdims=True)                  # (H, L, 1)
        alpha = e * pl.reciprocal(denom, approx=approx_recip)

        z = jnp.einsum('hqk,khd->qhd', alpha.astype(mxu_dtype), vb,
                       preferred_element_type=jnp.float32)          # (L, H, dk)
        z_rows.append(z.reshape(L, HD))

    # ---- single output projection for ALL rows (K = HD, lane-padded N) -------
    z_all = jnp.concatenate(z_rows, axis=0)                         # (Bt*L, HD)
    out = jnp.dot(z_all.astype(mxu_dtype), wo_ref[...].astype(mxu_dtype),
                  preferred_element_type=jnp.float32) + bo_ref[...]
    out_ref[...] = out.reshape(Bt, L, Cp)


def _const_spec(shape):
    """BlockSpec for a grid-invariant (constant index_map) input.

    Single-buffered: no second VMEM buffer and no re-issued DMA per grid step.
    Falls back silently if this Pallas version does not accept pipeline_mode.
    """
    index_map = lambda *_: (0,) * len(shape)
    try:
        return pl.BlockSpec(shape, index_map, pipeline_mode=pl.Buffered(1))
    except Exception:
        return pl.BlockSpec(shape, index_map)


def bigbird_self_attention(qx, kx, vx, params, *, multiNum, dk,
                           mxu_dtype=jnp.float32, batch_per_step=None):
    B, L, C = qx.shape
    H = multiNum
    HD = H * dk
    WQ, bQ, WK, bK, WV, bV, WO, bO = params

    # Fused QKV projection weight/bias (each input stream only reads its own
    # weight columns inside the kernel, so cross attention still works).
    w_qkv = jnp.concatenate([WQ, WK, WV], axis=1)                   # (C, 3*HD)
    b_qkv = jnp.concatenate([bQ, bK, bV]).reshape(1, 3 * HD)

    # Lane-dense output: pad the output-projection columns to a multiple of
    # 128 lanes so the kernel stores are unmasked vst; padded columns are
    # exactly 0 (zero weight + zero bias) and sliced away below.
    Cp = ((C + 127) // 128) * 128
    if Cp != C:
        wo = jnp.pad(WO, ((0, 0), (0, Cp - C)))
        bo = jnp.pad(bO, (0, Cp - C)).reshape(1, Cp)
    else:
        wo, bo = WO, bO.reshape(1, Cp)

    # Grid: one step carrying the whole batch by default (per-step overhead
    # dominates at small sizes on single-TensorCore v5e/v6e).
    # v7x: pass batch_per_step = ceil(B/2) so both TensorCores get a step.
    if batch_per_step is None:
        batch_per_step = B
    assert B % batch_per_step == 0, "batch_per_step must divide the batch"
    steps = B // batch_per_step

    approx_recip = jnp.dtype(mxu_dtype) != jnp.dtype(jnp.float32)
    kernel = functools.partial(_bigbird_attn_kernel, H, dk, mxu_dtype,
                               approx_recip)

    act_spec = pl.BlockSpec((batch_per_step, L, C), lambda b: (b, 0, 0))
    out_spec = pl.BlockSpec((batch_per_step, L, Cp), lambda b: (b, 0, 0))

    out = pl.pallas_call(
        kernel,
        out_shape=jax.ShapeDtypeStruct((B, L, Cp), jnp.float32),
        grid=(steps,),
        in_specs=[act_spec, act_spec, act_spec,
                  _const_spec((C, 3 * HD)), _const_spec((1, 3 * HD)),
                  _const_spec((HD, Cp)), _const_spec((1, Cp))],
        out_specs=out_spec,
        compiler_params=pltpu.CompilerParams(
            dimension_semantics=("parallel",),
            vmem_limit_bytes=32 * 1024 * 1024),
    )(qx, kx, vx, w_qkv, b_qkv, wo, bo)

    return out[..., :C] if Cp != C else out


def _reference(qx, kx, vx, params, *, multiNum, dk):
    """Pure-JAX mirror of the PyTorch forward (for verification)."""
    WQ, bQ, WK, bK, WV, bV, WO, bO = params
    B, L, C = qx.shape
    H = multiNum
    q = (qx @ WQ + bQ).reshape(B, L, H, dk).transpose(0, 2, 1, 3)
    k = (kx @ WK + bK).reshape(B, L, H, dk).transpose(0, 2, 1, 3)
    v = (vx @ WV + bV).reshape(B, L, H, dk).transpose(0, 2, 1, 3)
    s = jnp.einsum('bhld,bhmd->bhlm', q, k)
    r = np.arange(L)[:, None]
    c = np.arange(L)[None, :]
    mask = ((r == 0) | (r == L - 1) | (c == 0) | (c == L - 1)
            | (np.abs(r - c) <= 1)).astype(np.float32)
    s = s * mask / np.sqrt(dk)
    alpha = jax.nn.softmax(s, axis=-1)
    z = jnp.einsum('bhlm,bhmd->bhld', alpha, v)
    z = z.transpose(0, 2, 1, 3).reshape(B, L, H * dk)
    return z @ WO + bO


if __name__ == "__main__":
    B, L, feaSize = 2, 8, 32
    dk, multiNum, randomK = 8, 4, 2   # randomK kept for parity; its block is a no-op
    HD = dk * multiNum

    key = jax.random.PRNGKey(0)
    ks = jax.random.split(key, 11)
    qx = jax.random.normal(ks[0], (B, L, feaSize), jnp.float32)
    kx = jax.random.normal(ks[1], (B, L, feaSize), jnp.float32)
    vx = jax.random.normal(ks[2], (B, L, feaSize), jnp.float32)

    s_in = 1.0 / math.sqrt(feaSize)
    s_out = 1.0 / math.sqrt(HD)
    WQ = jax.random.normal(ks[3], (feaSize, HD), jnp.float32) * s_in
    bQ = jax.random.normal(ks[4], (HD,), jnp.float32) * 0.1
    WK = jax.random.normal(ks[5], (feaSize, HD), jnp.float32) * s_in
    bK = jax.random.normal(ks[6], (HD,), jnp.float32) * 0.1
    WV = jax.random.normal(ks[7], (feaSize, HD), jnp.float32) * s_in
    bV = jax.random.normal(ks[8], (HD,), jnp.float32) * 0.1
    WO = jax.random.normal(ks[9], (HD, feaSize), jnp.float32) * s_out
    bO = jax.random.normal(ks[10], (feaSize,), jnp.float32) * 0.1
    params = (WQ, bQ, WK, bK, WV, bV, WO, bO)

    ref = _reference(qx, kx, vx, params, multiNum=multiNum, dk=dk)

    # f32 MXU-operand path (default): tight check against the reference.
    out = bigbird_self_attention(qx, kx, vx, params, multiNum=multiNum, dk=dk)
    out = jax.block_until_ready(out)
    np.testing.assert_allclose(np.asarray(out), np.asarray(ref),
                               rtol=1e-5, atol=1e-5)

    # bf16 MXU-operand path (full-rate MXU on v5e/v6e/v7x; f32 accumulation
    # and f32 softmax).  Looser tolerance: bf16 operands lose ~3 digits.
    out_bf16 = jax.block_until_ready(
        bigbird_self_attention(qx, kx, vx, params, multiNum=multiNum, dk=dk,
                               mxu_dtype=jnp.bfloat16))
    np.testing.assert_allclose(np.asarray(out_bf16), np.asarray(ref),
                               rtol=5e-2, atol=5e-2)

    print("KERNEL_OK")
</pallas_src>

<mosaic_0001>
module attributes {stable_mosaic.version = 11 : i64} {
  func.func @_bigbird_attn_kernel(%arg0: i32, %arg1: memref<2x8x32xf32, #tpu.memory_space<vmem>>, %arg2: memref<2x8x32xf32, #tpu.memory_space<vmem>>, %arg3: memref<2x8x32xf32, #tpu.memory_space<vmem>>, %arg4: memref<32x96xf32, #tpu.memory_space<vmem>>, %arg5: memref<1x96xf32, #tpu.memory_space<vmem>>, %arg6: memref<32x128xf32, #tpu.memory_space<vmem>>, %arg7: memref<1x128xf32, #tpu.memory_space<vmem>>, %arg8: memref<2x8x128xf32, #tpu.memory_space<vmem>>) attributes {dimension_semantics = [#tpu.dimension_semantics<parallel>], iteration_bounds = array<i64: 1>, scalar_prefetch = 0 : i64, scratch_operands = 0 : i64, tpu.core_type = #tpu.core_type<tc>, window_params = [{transform_indices = @transform_0, window_bounds = array<i64: 2, 8, 32>}, {transform_indices = @transform_1, window_bounds = array<i64: 2, 8, 32>}, {transform_indices = @transform_2, window_bounds = array<i64: 2, 8, 32>}, {pipeline_mode = #tpu.pipeline_mode<synchronous>, transform_indices = @transform_3, window_bounds = array<i64: 32, 96>}, {pipeline_mode = #tpu.pipeline_mode<synchronous>, transform_indices = @transform_4, window_bounds = array<i64: 1, 96>}, {pipeline_mode = #tpu.pipeline_mode<synchronous>, transform_indices = @transform_5, window_bounds = array<i64: 32, 128>}, {pipeline_mode = #tpu.pipeline_mode<synchronous>, transform_indices = @transform_6, window_bounds = array<i64: 1, 128>}, {transform_indices = @transform_7, window_bounds = array<i64: 2, 8, 128>}]} {
    %c0 = arith.constant 0 : index
    %c0_0 = arith.constant 0 : index
    %c0_1 = arith.constant 0 : index
    %0 = vector.load %arg1[%c0, %c0_0, %c0_1] : memref<2x8x32xf32, #tpu.memory_space<vmem>>, vector<2x8x32xf32>
    %1 = vector.shape_cast %0 : vector<2x8x32xf32> to vector<16x32xf32>
    %c0_2 = arith.constant 0 : index
    %c0_3 = arith.constant 0 : index
    %c0_4 = arith.constant 0 : index
    %2 = vector.load %arg2[%c0_2, %c0_3, %c0_4] : memref<2x8x32xf32, #tpu.memory_space<vmem>>, vector<2x8x32xf32>
    %3 = vector.shape_cast %2 : vector<2x8x32xf32> to vector<16x32xf32>
    %c0_5 = arith.constant 0 : index
    %c0_6 = arith.constant 0 : index
    %c0_7 = arith.constant 0 : index
    %4 = vector.load %arg3[%c0_5, %c0_6, %c0_7] : memref<2x8x32xf32, #tpu.memory_space<vmem>>, vector<2x8x32xf32>
    %5 = vector.shape_cast %4 : vector<2x8x32xf32> to vector<16x32xf32>
    %6 = tpu.concatenate %1, %3, %5 in 0 : vector<16x32xf32>, vector<16x32xf32>, vector<16x32xf32> -> vector<48x32xf32>
    %c0_8 = arith.constant 0 : index
    %c0_9 = arith.constant 0 : index
    %7 = vector.load %arg4[%c0_8, %c0_9] : memref<32x96xf32, #tpu.memory_space<vmem>>, vector<32x96xf32>
    %cst = arith.constant dense<0.000000e+00> : vector<48x96xf32>
    %8 = tpu.matmul %6, %7, %cst {dimension_numbers = #tpu.dot_dimension_numbers<[1], [0], [0], [1], [0, 0, 1, 1], [], []>} : vector<48x32xf32>, vector<32x96xf32>, vector<48x96xf32> -> vector<48x96xf32>
    %c0_10 = arith.constant 0 : index
    %c0_11 = arith.constant 0 : index
    %9 = vector.load %arg5[%c0_10, %c0_11] : memref<1x96xf32, #tpu.memory_space<vmem>>, vector<1x96xf32>
    %10 = vector.broadcast %9 : vector<1x96xf32> to vector<48x96xf32>
    %11 = arith.addf %8, %10 : vector<48x96xf32>
    %12 = vector.extract_strided_slice %11 {offsets = [0, 0], sizes = [16, 32], strides = [1, 1]} : vector<48x96xf32> to vector<16x32xf32>
    %cst_12 = arith.constant 0.353553385 : f32
    %13 = vector.broadcast %cst_12 : f32 to vector<16x32xf32>
    %14 = arith.mulf %12, %13 : vector<16x32xf32>
    %15 = vector.extract_strided_slice %11 {offsets = [16, 32], sizes = [16, 32], strides = [1, 1]} : vector<48x96xf32> to vector<16x32xf32>
    %16 = vector.extract_strided_slice %11 {offsets = [32, 64], sizes = [16, 32], strides = [1, 1]} : vector<48x96xf32> to vector<16x32xf32>
    %17 = tpu.iota {dimensions = array<i32: 0>} : vector<8x8xi32>
    %18 = tpu.iota {dimensions = array<i32: 1>} : vector<8x8xi32>
    %c0_i32 = arith.constant 0 : i32
    %19 = vector.broadcast %c0_i32 : i32 to vector<8x8xi32>
    %20 = arith.cmpi eq, %17, %19 : vector<8x8xi32>
    %c7_i32 = arith.constant 7 : i32
    %21 = vector.broadcast %c7_i32 : i32 to vector<8x8xi32>
    %22 = arith.cmpi eq, %17, %21 : vector<8x8xi32>
    %23 = arith.ori %20, %22 : vector<8x8xi1>
    %c0_i32_13 = arith.constant 0 : i32
    %24 = vector.broadcast %c0_i32_13 : i32 to vector<8x8xi32>
    %25 = arith.cmpi eq, %18, %24 : vector<8x8xi32>
    %26 = arith.ori %23, %25 : vector<8x8xi1>
    %c7_i32_14 = arith.constant 7 : i32
    %27 = vector.broadcast %c7_i32_14 : i32 to vector<8x8xi32>
    %28 = arith.cmpi eq, %18, %27 : vector<8x8xi32>
    %29 = arith.ori %26, %28 : vector<8x8xi1>
    %30 = arith.subi %17, %18 : vector<8x8xi32>
    %31 = math.absi %30 : vector<8x8xi32>
    %c1_i32 = arith.constant 1 : i32
    %32 = vector.broadcast %c1_i32 : i32 to vector<8x8xi32>
    %33 = arith.cmpi sle, %31, %32 : vector<8x8xi32>
    %34 = arith.ori %29, %33 : vector<8x8xi1>
    %35 = vector.extract_strided_slice %14 {offsets = [0, 0], sizes = [8, 32], strides = [1, 1]} : vector<16x32xf32> to vector<8x32xf32>
    %36 = vector.shape_cast %35 : vector<8x32xf32> to vector<8x4x8xf32>
    %37 = vector.extract_strided_slice %15 {offsets = [0, 0], sizes = [8, 32], strides = [1, 1]} : vector<16x32xf32> to vector<8x32xf32>
    %38 = vector.shape_cast %37 : vector<8x32xf32> to vector<8x4x8xf32>
    %39 = vector.extract_strided_slice %16 {offsets = [0, 0], sizes = [8, 32], strides = [1, 1]} : vector<16x32xf32> to vector<8x32xf32>
    %40 = vector.shape_cast %39 : vector<8x32xf32> to vector<8x4x8xf32>
    "tpu.trace_start"() <{level = 10 : i32, message = "qhd,khd->hqk"}> : () -> ()
    %cst_15 = arith.constant dense<0.000000e+00> : vector<4x8x8xf32>
    %41 = tpu.matmul %36, %38, %cst_15 {dimension_numbers = #tpu.dot_dimension_numbers<[2], [2], [0], [0], [0, 1, 0, 0, 1, 0], [1], [1]>} : vector<8x4x8xf32>, vector<8x4x8xf32>, vector<4x8x8xf32> -> vector<4x8x8xf32>
    "tpu.trace_stop"() : () -> ()
    %42 = vector.shape_cast %34 : vector<8x8xi1> to vector<1x8x8xi1>
    %cst_16 = arith.constant 0.000000e+00 : f32
    %43 = vector.shape_cast %42 : vector<1x8x8xi1> to vector<1x8x8xi1>
    %44 = vector.broadcast %43 : vector<1x8x8xi1> to vector<4x8x8xi1>
    %45 = vector.broadcast %cst_16 : f32 to vector<4x8x8xf32>
    %46 = arith.select %44, %41, %45 : vector<4x8x8xi1>, vector<4x8x8xf32>
    %cst_17 = arith.constant dense<0xFF800000> : vector<4x8xf32>
    %47 = vector.multi_reduction <maximumf>, %46, %cst_17 [2] : vector<4x8x8xf32> to vector<4x8xf32>
    %48 = vector.shape_cast %47 : vector<4x8xf32> to vector<4x8x1xf32>
    %49 = vector.broadcast %48 : vector<4x8x1xf32> to vector<4x8x8xf32>
    %50 = arith.subf %46, %49 : vector<4x8x8xf32>
    %51 = math.exp %50 : vector<4x8x8xf32>
    %cst_18 = arith.constant dense<0.000000e+00> : vector<4x8xf32>
    %52 = vector.multi_reduction <add>, %51, %cst_18 [2] : vector<4x8x8xf32> to vector<4x8xf32>
    %53 = vector.shape_cast %52 : vector<4x8xf32> to vector<4x8x1xf32>
    %54 = tpu.reciprocal %53 : vector<4x8x1xf32> -> vector<4x8x1xf32>
    %55 = vector.broadcast %54 : vector<4x8x1xf32> to vector<4x8x8xf32>
    %56 = arith.mulf %51, %55 : vector<4x8x8xf32>
    "tpu.trace_start"() <{level = 10 : i32, message = "hqk,khd->qhd"}> : () -> ()
    %cst_19 = arith.constant dense<0.000000e+00> : vector<4x8x8xf32>
    %57 = tpu.matmul %40, %56, %cst_19 {dimension_numbers = #tpu.dot_dimension_numbers<[0], [2], [2], [1], [0, 1, 0, 2, 1, 1], [1], [0]>} : vector<8x4x8xf32>, vector<4x8x8xf32>, vector<4x8x8xf32> -> vector<4x8x8xf32>
    %58 = tpu.transpose %57, [2, 0, 1] : vector<4x8x8xf32> -> vector<8x4x8xf32>
    "tpu.trace_stop"() : () -> ()
    %59 = vector.shape_cast %58 : vector<8x4x8xf32> to vector<8x32xf32>
    %60 = vector.extract_strided_slice %14 {offsets = [8, 0], sizes = [8, 32], strides = [1, 1]} : vector<16x32xf32> to vector<8x32xf32>
    %61 = vector.shape_cast %60 : vector<8x32xf32> to vector<8x4x8xf32>
    %62 = vector.extract_strided_slice %15 {offsets = [8, 0], sizes = [8, 32], strides = [1, 1]} : vector<16x32xf32> to vector<8x32xf32>
    %63 = vector.shape_cast %62 : vector<8x32xf32> to vector<8x4x8xf32>
    %64 = vector.extract_strided_slice %16 {offsets = [8, 0], sizes = [8, 32], strides = [1, 1]} : vector<16x32xf32> to vector<8x32xf32>
    %65 = vector.shape_cast %64 : vector<8x32xf32> to vector<8x4x8xf32>
    "tpu.trace_start"() <{level = 10 : i32, message = "qhd,khd->hqk"}> : () -> ()
    %cst_20 = arith.constant dense<0.000000e+00> : vector<4x8x8xf32>
    %66 = tpu.matmul %61, %63, %cst_20 {dimension_numbers = #tpu.dot_dimension_numbers<[2], [2], [0], [0], [0, 1, 0, 0, 1, 0], [1], [1]>} : vector<8x4x8xf32>, vector<8x4x8xf32>, vector<4x8x8xf32> -> vector<4x8x8xf32>
    "tpu.trace_stop"() : () -> ()
    %67 = vector.shape_cast %34 : vector<8x8xi1> to vector<1x8x8xi1>
    %cst_21 = arith.constant 0.000000e+00 : f32
    %68 = vector.shape_cast %67 : vector<1x8x8xi1> to vector<1x8x8xi1>
    %69 = vector.broadcast %68 : vector<1x8x8xi1> to vector<4x8x8xi1>
    %70 = vector.broadcast %cst_21 : f32 to vector<4x8x8xf32>
    %71 = arith.select %69, %66, %70 : vector<4x8x8xi1>, vector<4x8x8xf32>
    %cst_22 = arith.constant dense<0xFF800000> : vector<4x8xf32>
    %72 = vector.multi_reduction <maximumf>, %71, %cst_22 [2] : vector<4x8x8xf32> to vector<4x8xf32>
    %73 = vector.shape_cast %72 : vector<4x8xf32> to vector<4x8x1xf32>
    %74 = vector.broadcast %73 : vector<4x8x1xf32> to vector<4x8x8xf32>
    %75 = arith.subf %71, %74 : vector<4x8x8xf32>
    %76 = math.exp %75 : vector<4x8x8xf32>
    %cst_23 = arith.constant dense<0.000000e+00> : vector<4x8xf32>
    %77 = vector.multi_reduction <add>, %76, %cst_23 [2] : vector<4x8x8xf32> to vector<4x8xf32>
    %78 = vector.shape_cast %77 : vector<4x8xf32> to vector<4x8x1xf32>
    %79 = tpu.reciprocal %78 : vector<4x8x1xf32> -> vector<4x8x1xf32>
    %80 = vector.broadcast %79 : vector<4x8x1xf32> to vector<4x8x8xf32>
    %81 = arith.mulf %76, %80 : vector<4x8x8xf32>
    "tpu.trace_start"() <{level = 10 : i32, message = "hqk,khd->qhd"}> : () -> ()
    %cst_24 = arith.constant dense<0.000000e+00> : vector<4x8x8xf32>
    %82 = tpu.matmul %65, %81, %cst_24 {dimension_numbers = #tpu.dot_dimension_numbers<[0], [2], [2], [1], [0, 1, 0, 2, 1, 1], [1], [0]>} : vector<8x4x8xf32>, vector<4x8x8xf32>, vector<4x8x8xf32> -> vector<4x8x8xf32>
    %83 = tpu.transpose %82, [2, 0, 1] : vector<4x8x8xf32> -> vector<8x4x8xf32>
    "tpu.trace_stop"() : () -> ()
    %84 = vector.shape_cast %83 : vector<8x4x8xf32> to vector<8x32xf32>
    %85 = tpu.concatenate %59, %84 in 0 : vector<8x32xf32>, vector<8x32xf32> -> vector<16x32xf32>
    %c0_25 = arith.constant 0 : index
    %c0_26 = arith.constant 0 : index
    %86 = vector.load %arg6[%c0_25, %c0_26] : memref<32x128xf32, #tpu.memory_space<vmem>>, vector<32x128xf32>
    %cst_27 = arith.constant dense<0.000000e+00> : vector<16x128xf32>
    %87 = tpu.matmul %85, %86, %cst_27 {dimension_numbers = #tpu.dot_dimension_numbers<[1], [0], [0], [1], [0, 0, 1, 1], [], []>} : vector<16x32xf32>, vector<32x128xf32>, vector<16x128xf32> -> vector<16x128xf32>
    %c0_28 = arith.constant 0 : index
    %c0_29 = arith.constant 0 : index
    %88 = vector.load %arg7[%c0_28, %c0_29] : memref<1x128xf32, #tpu.memory_space<vmem>>, vector<1x128xf32>
    %89 = vector.broadcast %88 : vector<1x128xf32> to vector<16x128xf32>
    %90 = arith.addf %87, %89 : vector<16x128xf32>
    %91 = vector.shape_cast %90 : vector<16x128xf32> to vector<2x8x128xf32>
    %c0_30 = arith.constant 0 : index
    %c0_31 = arith.constant 0 : index
    %c0_32 = arith.constant 0 : index
    %92 = vector.load %arg8[%c0_30, %c0_31, %c0_32] : memref<2x8x128xf32, #tpu.memory_space<vmem>>, vector<2x8x128xf32>
    tpu.vector_store %arg8[%c0_30, %c0_31, %c0_32], %91 {strides = array<i32>} : memref<2x8x128xf32, #tpu.memory_space<vmem>>, vector<2x8x128xf32>,
    return
  }
  func.func @transform_0(%arg0: i32) -> (i32, i32, i32) {
    %c0_i32 = arith.constant 0 : i32
    %c0_i32_0 = arith.constant 0 : i32
    %c0_i32_1 = arith.constant 0 : i32
    return %arg0, %c0_i32, %c0_i32_0 : i32, i32, i32
  }
  func.func @transform_1(%arg0: i32) -> (i32, i32, i32) {
    %c0_i32 = arith.constant 0 : i32
    %c0_i32_0 = arith.constant 0 : i32
    %c0_i32_1 = arith.constant 0 : i32
    return %arg0, %c0_i32, %c0_i32_0 : i32, i32, i32
  }
  func.func @transform_2(%arg0: i32) -> (i32, i32, i32) {
    %c0_i32 = arith.constant 0 : i32
    %c0_i32_0 = arith.constant 0 : i32
    %c0_i32_1 = arith.constant 0 : i32
    return %arg0, %c0_i32, %c0_i32_0 : i32, i32, i32
  }
  func.func @transform_3(%arg0: i32) -> (i32, i32) {
    %c0_i32 = arith.constant 0 : i32
    %c0_i32_0 = arith.constant 0 : i32
    %c0_i32_1 = arith.constant 0 : i32
    return %c0_i32, %c0_i32_0 : i32, i32
  }
  func.func @transform_4(%arg0: i32) -> (i32, i32) {
    %c0_i32 = arith.constant 0 : i32
    %c0_i32_0 = arith.constant 0 : i32
    %c0_i32_1 = arith.constant 0 : i32
    return %c0_i32, %c0_i32_0 : i32, i32
  }
  func.func @transform_5(%arg0: i32) -> (i32, i32) {
    %c0_i32 = arith.constant 0 : i32
    %c0_i32_0 = arith.constant 0 : i32
    %c0_i32_1 = arith.constant 0 : i32
    return %c0_i32, %c0_i32_0 : i32, i32
  }
  func.func @transform_6(%arg0: i32) -> (i32, i32) {
    %c0_i32 = arith.constant 0 : i32
    %c0_i32_0 = arith.constant 0 : i32
    %c0_i32_1 = arith.constant 0 : i32
    return %c0_i32, %c0_i32_0 : i32, i32
  }
  func.func @transform_7(%arg0: i32) -> (i32, i32, i32) {
    %c0_i32 = arith.constant 0 : i32
    %c0_i32_0 = arith.constant 0 : i32
    %c0_i32_1 = arith.constant 0 : i32
    return %arg0, %c0_i32, %c0_i32_0 : i32, i32, i32
  }
}

</mosaic_0001>

<bundles_post_ra>
// kernel: tpu_custom_call.1
= control target key start
LH: loop header
LB: loop body
LE: loop exit
PB: predicated region body
PF: predicated region fallthrough
CT: control target
= control target key end

     0   :  { %12 = vsyncpa [#allocation3], 0  ;;  %s3535_s0 = inlined_call_operand.hbm [shape: f32[2,8,32], index: 0, kind: input, shape index: {}]   ;;  %s3536_s1 = inlined_call_operand.hbm [shape: f32[2,8,32], index: 1, kind: input, shape index: {}]   ;;  %s3537_s2 = inlined_call_operand.hbm [shape: f32[2,8,32], index: 2, kind: input, shape index: {}]   ;;  %s3538_s3 = inlined_call_operand.hbm [shape: f32[32,96], index: 3, kind: input, shape index: {}]   ;;  %s3539_s4 = inlined_call_operand.vmem [shape: f32[1,96], index: 4, kind: input, shape index: {}]   ;;  %s3540_s5 = inlined_call_operand.hbm [shape: f32[32,128], index: 5, kind: input, shape index: {}]   ;;  %s3541_s6 = inlined_call_operand.vmem [shape: f32[1,128], index: 6, kind: input, shape index: {}]   ;;  %s3542_s7 = inlined_call_operand.hbm [shape: f32[2,8,128], index: 7, kind: output, shape index: {}]  }
   0x1   :  { %13 = vsyncpa [#allocation6], 0 }
   0x2   :  { %14 = vsyncpa [#allocation9], 0 }
   0x3   :  { %15 = vsyncpa [#allocation4], 0  ;;  %s3178_s24 = smov [#allocation5]   ;;  %s3179_s26 = smov [#allocation8]  }
   0x4   :  { %s33_s25 = sshll.u32 %s3178_s24, 4  ;;  %s57_s27 = sshll.u32 %s3179_s26, 4  ;;  %s34_s25 = int_to_ptr.vmem [resolvable:$true] %s33_s25  ;;  %s58_s27 = int_to_ptr.vmem [resolvable:$true] %s57_s27 }
   0x5   :  { %s3058_s28 = scalar_lea.vmem %s34_s25, 256  ;;  %p3063_p1 = scmp.lt.s32.totalorder %s34_s25, %s34_s25 }
   0x6   :  { %p3059_p0 = scmp.ne.s32.totalorder %s34_s25, %s3058_s28  ;;  %p3064_p2 = scmp.lt.s32.totalorder %s3058_s28, %s3058_s28 }
   0x8   :  { %p3065_p3 = por %p3064_p2, %p3063_p1 }
   0xa   :  { %p3066_p4 = pnand %p3065_p3, %p3059_p0 }
   0xc   :  { %3069 = shalt.err (!%p3066_p4)
}
   0xd   :  { %s3180_s29 = smov 128   ;;  %s3181_s30 = smov 8  }
   0xe   :  { %39 = dma.hbm_to_vmem [thread:$0]  %s3536_s1, 256, %s34_s25, [#allocation6], %s3180_s29, %s3180_s29, %s3181_s30  }
   0xf   :  { %s3078_s10 = scalar_lea.vmem %s58_s27, 512  ;;  %p3083_p6 = scmp.lt.s32.totalorder %s58_s27, %s58_s27 }
  0x10   :  { %p3079_p5 = scmp.ne.s32.totalorder %s58_s27, %s3078_s10  ;;  %p3084_p7 = scmp.lt.s32.totalorder %s3078_s10, %s3078_s10 }
  0x12   :  { %p3085_p8 = por %p3084_p7, %p3083_p6 }
  0x14   :  { %p3086_p9 = pnand %p3085_p8, %p3079_p5 }
  0x16   :  { %3089 = shalt.err (!%p3086_p9)
}
  0x17   :  { %63 = dma.hbm_to_vmem [thread:$0]  %s3538_s3, 512, %s58_s27, [#allocation9], %s3180_s29, %s3180_s29, %s3181_s30  }
  0x18   :  { %s3182_s13 = smov [#allocation2]   ;;  %s3183_s15 = smov [#allocation7]  }
  0x19   :  { %s21_s14 = sshll.u32 %s3182_s13, 4  ;;  %s45_s16 = sshll.u32 %s3183_s15, 4  ;;  %s22_s14 = int_to_ptr.vmem [resolvable:$true] %s21_s14  ;;  %s46_s16 = int_to_ptr.vmem [resolvable:$true] %s45_s16 }
  0x1a   :  { %s3098_s1 = scalar_lea.vmem %s22_s14, 256  ;;  %p3103_p11 = scmp.lt.s32.totalorder %s22_s14, %s22_s14 }
  0x1b   :  { %p3099_p10 = scmp.ne.s32.totalorder %s22_s14, %s3098_s1  ;;  %p3104_p12 = scmp.lt.s32.totalorder %s3098_s1, %s3098_s1 }
  0x1d   :  { %p3105_p13 = por %p3104_p12, %p3103_p11 }
  0x1f   :  { %p3106_p0 = pnand %p3105_p13, %p3099_p10 }
  0x21   :  { %3109 = shalt.err (!%p3106_p0)
}
  0x22   :  { %27 = dma.hbm_to_vmem [thread:$0]  %s3535_s0, 256, %s22_s14, [#allocation3], %s3180_s29, %s3180_s29, %s3181_s30  }
  0x23   :  { %s3118_s3 = scalar_lea.vmem %s46_s16, 256  ;;  %p3123_p2 = scmp.lt.s32.totalorder %s46_s16, %s46_s16 }
  0x24   :  { %p3119_p1 = scmp.ne.s32.totalorder %s46_s16, %s3118_s3  ;;  %p3124_p3 = scmp.lt.s32.totalorder %s3118_s3, %s3118_s3 }
  0x26   :  { %p3125_p4 = por %p3124_p3, %p3123_p2 }
  0x28   :  { %p3126_p5 = pnand %p3125_p4, %p3119_p1 }
  0x2a   :  { %3129 = shalt.err (!%p3126_p5)
}
  0x2b   :  { %51 = dma.hbm_to_vmem [thread:$0]  %s3537_s2, 256, %s46_s16, [#allocation6], %s3180_s29, %s3180_s29, %s3181_s30  }
  0x2c   :  { %s3184_s21 = smov [#allocation10]  }
  0x2d   :  { %s71_s22 = sshll.u32 %s3184_s21, 4  ;;  %s72_s22 = int_to_ptr.vmem [resolvable:$true] %s71_s22 }
  0x2e   :  { %s3138_s23 = scalar_lea.vmem %s72_s22, 512  ;;  %p3143_p7 = scmp.lt.s32.totalorder %s72_s22, %s72_s22 }
  0x2f   :  { %p3139_p6 = scmp.ne.s32.totalorder %s72_s22, %s3138_s23  ;;  %p3144_p8 = scmp.lt.s32.totalorder %s3138_s23, %s3138_s23 }
  0x31   :  { %p3145_p9 = por %p3144_p8, %p3143_p7 }
  0x33   :  { %p3146_p10 = pnand %p3145_p9, %p3139_p6 }
  0x35   :  { %3149 = shalt.err (!%p3146_p10)
}
  0x36   :  { %77 = dma.hbm_to_vmem [thread:$0]  %s3540_s5, 512, %s72_s22, [#allocation9], %s3180_s29, %s3180_s29, %s3181_s30  }
  0x37   :  { %3170 = dma.done.wait [#allocation3], 256  }
  0x38   :  { %3171 = vsyncadd [#allocation3], 4294967040 }
  0x39   :  { %3172 = dma.done.wait [#allocation6], 512  }
  0x3a   :  { %3173 = vsyncadd [#allocation6], 4294966784 }
  0x3b   :  { %3174 = dma.done.wait [#allocation9], 1024  }
  0x3c   :  { %3175 = vsyncadd [#allocation9], 4294966272  ;;  %vm112_vm0 = vcmask 261120   ;;  %v104_v0 = vld [vmem:[#allocation8 + $0x18] sm:$0xff]  ;;  %v103_v1 = vld [vmem:[#allocation8 + $0x10] sm:$0xff]  ;;  %s3185_s25 = smov 104   ;;  %v228_v37 = vlaneseq }
  0x3d   :  { %2890 = vmatprep.subr.mxu0 %v104_v0  ;;  %v95_v2 = vld [vmem:[#allocation2] sm:$0xff]  ;;  %v102_v3 = vld [vmem:[#allocation8 + $0x8] sm:$0xff]  ;;  %v101_v4 = vld [vmem:[#allocation8] sm:$0xff]  ;;  %s3186_s26 = smov 120   ;;  %s3187_s27 = smov 112   ;;  %v3189_v19 = vmov 0.0  }
  0x3e   :  { %2891 = vmatpush3.msra.mxu0 %v104_v0  ;;  %2898 = vmatprep.mubr.msk.f32.mxu0 %vm112_vm0, %v95_v2  ;;  %v96_v5 = vld [vmem:[#allocation2 + $0x8] sm:$0xff]  ;;  %v97_v6 = vld [vmem:[#allocation5] sm:$0xff]  ;;  %v98_v7 = vld [vmem:[#allocation5 + $0x8] sm:$0xff]  ;;  %s3188_s28 = smov 96   ;;  %vm3190_vm1 = vmmov 0   ;;  %vm406_vm2 = vcmask 64512  }
  0x3f   :  { %2892 = vmatprep.subr.mxu0 %v103_v1  ;;  %v99_v8 = vld [vmem:[#allocation7] sm:$0xff]  ;;  %v100_v9 = vld [vmem:[#allocation7 + $0x8] sm:$0xff]  ;;  %2912 = vmatprep.subr.mxu1 %v3189_v19  ;;  %v3331_v38 = vshrl.u32 %v228_v37, 7  ;;  %v231_v39 = vand.u32 127, %v228_v37  ;;  %v3191_v43 = vmov 0   ;;  %s3195_s8 = smov 16  }
  0x40   :  { %2893 = vmatpush3.msra.mxu0 %v103_v1  ;;  %v3279_v13 = vld [vmem:[%s3539_s4] ss:$0 sm:$0xff]  ;;  %2914 = vmatprep.mubr.msk.f32.mxu1 %vm3190_vm1, %v3189_v19  ;;  %s3192_s4 = smov 64   ;;  %s3196_s9 = smov 24   ;;  %vm1466_vm13 = vcmask 130048   ;;  %vm1468_vm14 = vcmask 195584  }
  0x41   :  { %2894 = vmatprep.subr.mxu0 %v102_v3  ;;  %v239_v40 = vsub.s32 %v3331_v38, %v231_v39  ;;  %vm232_vm3 = vcmp.eq.s32.totalorder %v3331_v38, 0  ;;  %vm233_vm4 = vcmp.eq.s32.totalorder %v3331_v38, 7  ;;  %vm235_vm6 = vcmp.eq.s32.totalorder %v231_v39, 0  ;;  %s3197_s12 = smov [#allocation11]  }
  0x42   :  { %2895 = vmatpush3.msra.mxu0 %v102_v3  ;;  %vm234_vm5 = vmor %vm232_vm3, %vm233_vm4  ;;  %vm237_vm8 = vcmp.eq.s32.totalorder %v231_v39, 7  ;;  %s2789_s13 = sshll.u32 %s3197_s12, 4  ;;  %s2790_s13 = int_to_ptr.vmem [resolvable:$true] %s2789_s13 }
  0x43   :  { %2896 = vmatprep.subr.mxu0 %v101_v4  ;;  %v241_v41 = vsub.s32 0, %v239_v40  ;;  %vm236_vm7 = vmor %vm234_vm5, %vm235_vm6  ;;  %s3150_s14 = scalar_lea.vmem %s2790_s13, 256  ;;  %p3155_p12 = scmp.lt.s32.totalorder %s2790_s13, %s2790_s13 }
  0x44   :  { %2897 = vmatpush3.msra.mxu0 %v101_v4  ;;  %vm238_vm9 = vmor %vm236_vm7, %vm237_vm8  ;;  %p3151_p11 = scmp.ne.s32.totalorder %s2790_s13, %s3150_s14  ;;  %p3156_p13 = scmp.lt.s32.totalorder %s3150_s14, %s3150_s14 }
  0x45   :  { %2899 = vmatmul.mubr.msk.f32.vlgmr.msra.gmra.mxu0 %vm112_vm0, %v96_v5  ;;  %2907 = vmatprep.subr.mxu0 %v3189_v19  ;;  %v2810_v42 = vmin.u32 %v241_v41, %v239_v40 }
  0x46   :  { %2901 = vmatprep.mubr.msk.f32.mxu0 %vm112_vm0, %v97_v6  ;;  %p3157_p0 = por %p3156_p13, %p3155_p12 }
  0x47   :  { %vm243_vm10 = vcmp.le.s32.totalorder %v2810_v42, 1 }
  0x48   :  { %vm244_vm11 = vmor %vm238_vm9, %vm243_vm10  ;;  %p3158_p1 = pnand %p3157_p0, %p3151_p11 }
  0x49   :  { %2902 = vmatmul.mubr.msk.f32.gmra.mxu0 %vm112_vm0, %v98_v7  ;;  %v3336_v44 = vsel %vm244_vm11, 1, %v3191_v43 }
  0x4a   :  { %2904 = vmatprep.mubr.msk.f32.mxu0 %vm112_vm0, %v99_v8  ;;  %vm696_vm12 = vcmp.eq.s32.totalorder %v3336_v44, 1 }
  0x4d   :  { %2905 = vmatmul.mubr.msk.f32.gmra.mxu0 %vm112_vm0, %v100_v9 }
  0x4e   :  { %2909 = vmatprep.mubr.msk.f32.mxu0 %vm3190_vm1, %v3189_v19 }
 0x105   :  { %v3274_v10 = vpop.f32.mrf.mxu0 }
 0x106   :  { %v203_v6 = vadd.f32 %v3274_v10, %v3279_v13 }
 0x107   :  { %v197_v11 = vpop.f32.mrf.mxu0 }
 0x108   :  { %v198_v16 = vadd.f32 %v3279_v13, %v197_v11  ;;  %v3367_v8 = vmul.f32 0.35355338, %v203_v6 }
 0x109   :  { %v2903_v12 = vpop.f32.mrf.mxu0 }
 0x10a   :  { %v226_v20 = vmul.f32 0.35355338, %v198_v16  ;;  %v3309_v26 = vadd.f32 %v2903_v12, %v3279_v13 }
 0x10b   :  { %v207_v14 = vpop.f32.mrf.mxu0 }
 0x10c   :  { %v208_v15 = vadd.f32 %v3279_v13, %v207_v14 }
 0x10d   :  { %v3299_v23 = vpop.f32.mrf.mxu0 }
 0x10e   :  { %257 = vrot.lane.b32.xlu1 %v208_v15, %s3185_s25  ;;  %253 = vrot.lane.b32.xlu0 %v208_v15, %s3186_s26 }
 0x10f   :  { %v217_v24 = vpop.f32.mrf.mxu0 }
 0x110   :  { %v3302_v25 = vadd.f32 %v3279_v13, %v217_v24 }
 0x112   :  { %255 = vrot.lane.b32.xlu0 %v208_v15, %s3187_s27 }
 0x116   :  { %266 = vrot.lane.b32.xlu0 %v208_v15, %s3188_s28 }
 0x180   :  { %v258_v17 = vpop.permute.xlu1 %257  ;;  %v254_v18 = vpop.permute.xlu0 %253 }
 0x181   :  { %272 = vrot.lane.b32.xlu0 %v258_v17, %s3188_s28  ;;  %268 = vrot.lane.b32.xlu1 %v254_v18, %s3188_s28 }
 0x184   :  { %v256_v21 = vpop.permute.xlu0 %255 }
 0x185   :  { %270 = vrot.lane.b32.xlu1 %v256_v21, %s3188_s28  ;;  %248 = vrot.lane.b32.xlu0 %v226_v20, %s3187_s27 }
 0x188   :  { %v267_v22 = vpop.permute.xlu0 %266 }
 0x189   :  { %246 = vrot.lane.b32.xlu1 %v226_v20, %s3186_s26 }
 0x18d   :  { %250 = vrot.lane.b32.xlu1 %v226_v20, %s3185_s25 }
 0x1b6   :  { %278 = vxpose.xlu1.b32.start.end [1/1] (short) (narrow) %v267_v22, 8 }
 0x1d4   :  { %260 = vrot.lane.b32.xlu1 %v3302_v25, %s3186_s26 }
 0x1d8   :  { %264 = vrot.lane.b32.xlu1 %v3302_v25, %s3185_s25 }
 0x1dc   :  { %1478 = vrot.lane.b32.xlu1 %v3309_v26, %s3186_s26 }
 0x1f3   :  { %v269_v27 = vpop.permute.xlu1 %268  ;;  %v273_v29 = vpop.permute.xlu0 %272 }
 0x1f4   :  { %310 = vxpose.xlu0.b32.start.end [1/1] (short) (narrow) %v269_v27, 8 }
 0x1f7   :  { %v271_v28 = vpop.permute.xlu1 %270  ;;  %v249_v33 = vpop.permute.xlu0 %248 }
 0x1f8   :  { %342 = vxpose.xlu0.b32.start.end [1/1] (short) (narrow) %v271_v28, 8 }
 0x1fb   :  { %v247_v30 = vpop.permute.xlu1 %246 }
 0x1fc   :  { %374 = vxpose.xlu0.b32.start.end [1/1] (short) (narrow) %v273_v29, 8 }
 0x1ff   :  { %v251_v31 = vpop.permute.xlu1 %250 }
 0x225   :  { %262 = vrot.lane.b32.xlu0 %v3302_v25, %s3187_s27 }
 0x232   :  { %v294_v32 = vpop.trf.xlu1 }
 0x233   :  { %2908 = vmatpush3.msra.mxu0 %v294_v32 }
 0x234   :  { %2910 = vmatmul.mubr.msk.f32.vlgmr.msra.gmra.mxu0 %vm406_vm2, %v226_v20  ;;  %2932 = vmatprep.subr.mxu0 %v3189_v19 }
 0x235   :  { %2934 = vmatprep.mubr.msk.f32.mxu0 %vm3190_vm1, %v3189_v19 }
 0x246   :  { %v261_v61 = vpop.permute.xlu1 %260 }
 0x24a   :  { %v265_v62 = vpop.permute.xlu1 %264 }
 0x24e   :  { %v1479_v63 = vpop.permute.xlu1 %1478 }
 0x270   :  { %v326_v34 = vpop.trf.xlu0 }
 0x271   :  { %2913 = vmatpush3.msra.mxu1 %v326_v34 }
 0x272   :  { %2915 = vmatmul.mubr.msk.f32.vlgmr.msra.gmra.mxu1 %vm406_vm2, %v247_v30  ;;  %2917 = vmatprep.subr.mxu1 %v3189_v19 }
 0x273   :  { %2919 = vmatprep.mubr.msk.f32.mxu1 %vm3190_vm1, %v3189_v19 }
 0x274   :  { %v358_v35 = vpop.trf.xlu0 }
 0x275   :  { %2918 = vmatpush3.msra.mxu1 %v358_v35 }
 0x276   :  { %2920 = vmatmul.mubr.msk.f32.vlgmr.msra.gmra.mxu1 %vm406_vm2, %v249_v33  ;;  %2922 = vmatprep.subr.mxu1 %v3189_v19 }
 0x277   :  { %2924 = vmatprep.mubr.msk.f32.mxu1 %vm3190_vm1, %v3189_v19 }
 0x278   :  { %v390_v36 = vpop.trf.xlu0 }
 0x279   :  { %2923 = vmatpush3.msra.mxu1 %v390_v36 }
 0x27a   :  { %2925 = vmatmul.mubr.msk.f32.vlgmr.msra.gmra.mxu1 %vm406_vm2, %v251_v31  ;;  %2927 = vmatprep.subr.mxu1 %v3189_v19 }
 0x27b   :  { %2929 = vmatprep.mubr.msk.f32.mxu1 %vm3190_vm1, %v3189_v19 }
 0x297   :  { %v263_v0 = vpop.permute.xlu0 %262 }
 0x2f4   :  { %v475_v45 = vpop.f32.mrf.mxu0 }
 0x2f5   :  { %v697_v46 = vsel %vm696_vm12, %v475_v45, 0.0 }
 0x2f6   :  { %v2911_v47 = vpop.f32.mrf.mxu0  ;;  %v701_v48 = vsel %vm406_vm2, %v697_v46, -inf }
 0x2f7   :  { %702 = vmax.xlane.f32.xlu0 %v701_v48 }
 0x332   :  { %v547_v49 = vpop.f32.mrf.mxu1 }
 0x333   :  { %v698_v50 = vsel %vm696_vm12, %v547_v49, 0.0 }
 0x334   :  { %v2916_v51 = vpop.f32.mrf.mxu1  ;;  %v704_v52 = vsel %vm406_vm2, %v698_v50, -inf }
 0x335   :  { %705 = vmax.xlane.f32.xlu1 %v704_v52 }
 0x336   :  { %v619_v53 = vpop.f32.mrf.mxu1 }
 0x337   :  { %v699_v54 = vsel %vm696_vm12, %v619_v53, 0.0 }
 0x338   :  { %v2921_v55 = vpop.f32.mrf.mxu1  ;;  %v707_v56 = vsel %vm406_vm2, %v699_v54, -inf }
 0x339   :  { %708 = vmax.xlane.f32.xlu1 %v707_v56 }
 0x33a   :  { %v691_v57 = vpop.f32.mrf.mxu1 }
 0x33b   :  { %v700_v58 = vsel %vm696_vm12, %v691_v57, 0.0 }
 0x33c   :  { %v2926_v59 = vpop.f32.mrf.mxu1  ;;  %v710_v60 = vsel %vm406_vm2, %v700_v58, -inf }
 0x33d   :  { %711 = vmax.xlane.f32.xlu0 %v710_v60 }
 0x34a   :  { %1482 = vrot.lane.b32.xlu1 %v3309_v26, %s3185_s25 }
 0x34e   :  { %747 = vrot.lane.b32.xlu1 %v261_v61, %s3192_s4 }
 0x352   :  { %751 = vrot.lane.b32.xlu1 %v265_v62, %s3192_s4 }
 0x353   :  { %1480 = vrot.lane.b32.xlu0 %v3309_v26, %s3187_s27 }
 0x356   :  { %1493 = vrot.lane.b32.xlu1 %v1479_v63, %s3188_s28 }
 0x357   :  { %745 = vrot.lane.b32.xlu0 %v3302_v25, %s3192_s4 }
 0x35b   :  { %749 = vrot.lane.b32.xlu0 %v263_v0, %s3192_s4 }
 0x35f   :  { %1491 = vrot.lane.b32.xlu0 %v3309_v26, %s3188_s28 }
 0x380   :  { %v703_v2 = vpop.xlane.xlu0 %702 }
 0x381   :  { %v713_v11 = vsub.f32 %v697_v46, %v703_v2 }
 0x383   :  { %v717_v15 = vmul.f32 1.442695, %v713_v11 }
 0x3be   :  { %v706_v1 = vpop.xlane.xlu1 %705 }
 0x3bf   :  { %v714_v9 = vsub.f32 %v698_v50, %v706_v1 }
 0x3c1   :  { %v719_v12 = vmul.f32 1.442695, %v714_v9 }
 0x3c2   :  { %v709_v3 = vpop.xlane.xlu1 %708 }
 0x3c3   :  { %v715_v16 = vsub.f32 %v699_v54, %v709_v3  ;;  %3018 = vpow2.f32 %v719_v12 }
 0x3c4   :  { %3020 = vpow2.f32 %v717_v15 }
 0x3c5   :  { %v721_v18 = vmul.f32 1.442695, %v715_v16 }
 0x3c6   :  { %v712_v4 = vpop.xlane.xlu0 %711  ;;  %v1483_v5 = vpop.permute.xlu1 %1482 }
 0x3c7   :  { %1497 = vrot.lane.b32.xlu1 %v1483_v5, %s3188_s28  ;;  %v716_v14 = vsub.f32 %v700_v58, %v712_v4 }
 0x3c9   :  { %v723_v17 = vmul.f32 1.442695, %v716_v14 }
 0x3ca   :  { %v1481_v7 = vpop.permute.xlu0 %1480  ;;  %v748_v29 = vpop.permute.xlu1 %747 }
 0x3cb   :  { %1495 = vrot.lane.b32.xlu0 %v1481_v7, %s3188_s28  ;;  %3022 = vpow2.f32 %v723_v17 }
 0x3cc   :  { %3024 = vpow2.f32 %v721_v18 }
 0x3ce   :  { %v746_v28 = vpop.permute.xlu0 %745  ;;  %v752_v31 = vpop.permute.xlu1 %751 }
 0x3cf   :  { %1471 = vrot.lane.b32.xlu0 %v3367_v8, %s3186_s26 }
 0x3d0   :  { %v3019_v10 = vpop.eup %3018 }
 0x3d1   :  { %v3021_v20 = vpop.eup %3020  ;;  %v728_v21 = vsel %vm406_vm2, %v3019_v10, 0.0 }
 0x3d2   :  { %v725_v24 = vsel %vm406_vm2, %v3021_v20, 0.0  ;;  %v750_v30 = vpop.permute.xlu0 %749  ;;  %v1494_v33 = vpop.permute.xlu1 %1493 }
 0x3d6   :  { %v1492_v32 = vpop.permute.xlu0 %1491 }
 0x3d8   :  { %v3023_v22 = vpop.eup %3022 }
 0x3d9   :  { %v3025_v25 = vpop.eup %3024  ;;  %v734_v26 = vsel %vm406_vm2, %v3023_v22, 0.0 }
 0x3da   :  { %v731_v27 = vsel %vm406_vm2, %v3025_v25, 0.0 }
 0x3eb   :  { %729 = vadd.xlane.f32.xlu1 %v728_v21 }
 0x3ee   :  { %726 = vadd.xlane.f32.xlu0 %v725_v24 }
 0x3ef   :  { %735 = vadd.xlane.f32.xlu1 %v734_v26 }
 0x3f2   :  { %732 = vadd.xlane.f32.xlu0 %v731_v27 }
 0x400   :  { %1473 = vrot.lane.b32.xlu1 %v3367_v8, %s3187_s27 }
 0x408   :  { %1475 = vrot.lane.b32.xlu0 %v3367_v8, %s3185_s25 }
 0x426   :  { %789 = vxpose.xlu0.b32.start.end [1/1] (short) (narrow) %v748_v29, 8 }
 0x429   :  { %757 = vxpose.xlu1.b32.start.end [1/1] (short) (narrow) %v746_v28, 8 }
 0x42a   :  { %821 = vxpose.xlu0.b32.start.end [1/1] (short) (narrow) %v750_v30, 8 }
 0x42d   :  { %1503 = vxpose.xlu1.b32.start.end [1/1] (short) (narrow) %v1492_v32, 8 }
 0x42e   :  { %853 = vxpose.xlu0.b32.start.end [1/1] (short) (narrow) %v752_v31, 8 }
 0x432   :  { %1535 = vxpose.xlu0.b32.start.end [1/1] (short) (narrow) %v1494_v33, 8 }
 0x439   :  { %v1498_v34 = vpop.permute.xlu1 %1497 }
 0x43a   :  { %1599 = vxpose.xlu0.b32.start.end [1/1] (short) (narrow) %v1498_v34, 8 }
 0x43d   :  { %v1496_v35 = vpop.permute.xlu0 %1495 }
 0x43e   :  { %1567 = vxpose.xlu1.b32.start.end [1/1] (short) (narrow) %v1496_v35, 8 }
 0x441   :  { %v1472_v36 = vpop.permute.xlu0 %1471 }
 0x474   :  { %v730_v37 = vpop.xlane.xlu1 %729 }
 0x475   :  { %3026 = vrcp.f32 %v730_v37 }
 0x477   :  { %v727_v39 = vpop.xlane.xlu0 %726 }
 0x478   :  { %3028 = vrcp.f32 %v727_v39  ;;  %v736_v45 = vpop.xlane.xlu1 %735 }
 0x479   :  { %3030 = vrcp.f32 %v736_v45 }
 0x47b   :  { %v733_v46 = vpop.xlane.xlu0 %732 }
 0x47c   :  { %3032 = vrcp.f32 %v733_v46  ;;  %v1474_v49 = vpop.permute.xlu1 %1473 }
 0x47f   :  { %v1476_v47 = vpop.permute.xlu0 %1475 }
 0x482   :  { %v3027_v40 = vpop.eup %3026 }
 0x483   :  { %v742_v41 = vmul.f32 %v3027_v40, %v3019_v10  ;;  %v223_v10 = vadd.f32 %v3299_v23, %v3279_v13 }
 0x485   :  { %v3029_v42 = vpop.eup %3028  ;;  %2933 = vmatpush3.xpose.msk.msra.mxu0 %vm406_vm2, %v742_v41 }
 0x486   :  { %v741_v43 = vmul.f32 %v3029_v42, %v3021_v20  ;;  %2942 = vmatprep.subr.mxu0 %v3189_v19  ;;  %v3031_v48 = vpop.eup %3030 }
 0x487   :  { %v744_v52 = vmul.f32 %v3031_v48, %v3023_v22 }
 0x488   :  { %2928 = vmatpush3.xpose.msk.msra.mxu1 %vm406_vm2, %v741_v43 }
 0x489   :  { %2937 = vmatprep.subr.mxu1 %v3189_v19  ;;  %v3033_v50 = vpop.eup %3032 }
 0x48a   :  { %v743_v54 = vmul.f32 %v3033_v50, %v3025_v25 }
 0x4a2   :  { %v805_v51 = vpop.trf.xlu0 }
 0x4a3   :  { %2935 = vmatmul.mubr.msk.f32.vlgmr.msra.gmra.mxu0 %vm406_vm2, %v805_v51 }
 0x4a4   :  { %2943 = vmatpush3.xpose.msk.msra.mxu0 %vm406_vm2, %v744_v52  ;;  %2944 = vmatprep.mubr.msk.f32.mxu0 %vm3190_vm1, %v3189_v19 }
 0x4a5   :  { %v773_v53 = vpop.trf.xlu1  ;;  %2952 = vmatprep.subr.mxu0 %v3189_v19 }
 0x4a6   :  { %v837_v55 = vpop.trf.xlu0  ;;  %2930 = vmatmul.mubr.msk.f32.vlgmr.msra.gmra.mxu1 %vm406_vm2, %v773_v53 }
 0x4a7   :  { %2938 = vmatpush3.xpose.msk.msra.mxu1 %vm406_vm2, %v743_v54  ;;  %2939 = vmatprep.mubr.msk.f32.mxu1 %vm3190_vm1, %v3189_v19 }
 0x4a8   :  { %2947 = vmatprep.subr.mxu1 %v3189_v19 }
 0x4a9   :  { %v1519_v56 = vpop.trf.xlu1 }
 0x4aa   :  { %v869_v57 = vpop.trf.xlu0  ;;  %2940 = vmatmul.mubr.msk.f32.vlgmr.msra.gmra.mxu1 %vm406_vm2, %v837_v55 }
 0x4ab   :  { %2945 = vmatmul.mubr.msk.f32.vlgmr.msra.gmra.mxu0 %vm406_vm2, %v869_v57  ;;  %2948 = vmatpush3.msra.mxu1 %v1519_v56 }
 0x4ac   :  { %2949 = vmatprep.mubr.msk.f32.mxu1 %vm3190_vm1, %v3189_v19  ;;  %2954 = vmatprep.mubr.msk.f32.mxu0 %vm3190_vm1, %v3189_v19 }
 0x4ad   :  { %2957 = vmatprep.subr.mxu1 %v3189_v19 }
 0x4ae   :  { %v1551_v58 = vpop.trf.xlu0  ;;  %2950 = vmatmul.mubr.msk.f32.vlgmr.msra.gmra.mxu1 %vm406_vm2, %v3367_v8 }
 0x4af   :  { %2953 = vmatpush3.msra.mxu0 %v1551_v58  ;;  %2959 = vmatprep.mubr.msk.f32.mxu1 %vm3190_vm1, %v3189_v19 }
 0x4b0   :  { %2955 = vmatmul.mubr.msk.f32.vlgmr.msra.gmra.mxu0 %vm406_vm2, %v1472_v36  ;;  %2962 = vmatprep.subr.mxu0 %v3189_v19 }
 0x4b1   :  { %2964 = vmatprep.mubr.msk.f32.mxu0 %vm3190_vm1, %v3189_v19 }
 0x4b6   :  { %v1615_v59 = vpop.trf.xlu0 }
 0x4b7   :  { %2963 = vmatpush3.msra.mxu0 %v1615_v59 }
 0x4b8   :  { %2965 = vmatmul.mubr.msk.f32.vlgmr.msra.gmra.mxu0 %vm406_vm2, %v1476_v47  ;;  %2972 = vmatprep.subr.mxu0 %v3189_v19 }
 0x4b9   :  { %2974 = vmatprep.mubr.msk.f32.mxu0 %vm3190_vm1, %v3189_v19 }
 0x4ba   :  { %v1583_v60 = vpop.trf.xlu1 }
 0x4bb   :  { %2958 = vmatpush3.msra.mxu1 %v1583_v60 }
 0x4bc   :  { %2960 = vmatmul.mubr.msk.f32.vlgmr.msra.gmra.mxu1 %vm406_vm2, %v1474_v49  ;;  %2967 = vmatprep.subr.mxu1 %v3189_v19 }
 0x4bd   :  { %2969 = vmatprep.mubr.msk.f32.mxu1 %vm3190_vm1, %v3189_v19 }
 0x563   :  { %v3416_v61 = vpop.f32.mrf.mxu0 }
 0x565   :  { %v2936_v62 = vpop.f32.mrf.mxu0 }
 0x566   :  { %v3418_v63 = vpop.f32.mrf.mxu1 }
 0x568   :  { %v2931_v0 = vpop.f32.mrf.mxu1 }
 0x56a   :  { %v3420_v1 = vpop.f32.mrf.mxu1 }
 0x56b   :  { %v3422_v2 = vpop.f32.mrf.mxu0 }
 0x56c   :  { %v2941_v3 = vpop.f32.mrf.mxu1 }
 0x56d   :  { %v2946_v4 = vpop.f32.mrf.mxu0  ;;  %v3193_v3 = vmov 1983009808  }
 0x56e   :  { %v1699_v5 = vpop.f32.mrf.mxu1  ;;  %v1320_v4 = vunpack.c.l.s4 %v3193_v3 }
 0x56f   :  { %v1919_v6 = vsel %vm696_vm12, %v1699_v5, 0.0  ;;  %v3194_v5 = vmov 1934713408  }
 0x570   :  { %v2951_v7 = vpop.f32.mrf.mxu1  ;;  %v1771_v8 = vpop.f32.mrf.mxu0  ;;  %v1923_v9 = vsel %vm406_vm2, %v1919_v6, -inf }
 0x571   :  { %v1920_v11 = vsel %vm696_vm12, %v1771_v8, 0.0  ;;  %1924 = vmax.xlane.f32.xlu1 %v1923_v9  ;;  %v1321_v9 = vunpack.c.0.s8 %v1320_v4 }
 0x572   :  { %v2956_v12 = vpop.f32.mrf.mxu0  ;;  %v1926_v14 = vsel %vm406_vm2, %v1920_v11, -inf }
 0x573   :  { %1927 = vmax.xlane.f32.xlu0 %v1926_v14  ;;  %v3468_v12 = vsub.s32 %v1321_v9, %v3331_v38 }
 0x578   :  { %v1915_v15 = vpop.f32.mrf.mxu0 }
 0x579   :  { %v1922_v22 = vsel %vm696_vm12, %v1915_v15, 0.0 }
 0x57a   :  { %v2966_v16 = vpop.f32.mrf.mxu0  ;;  %v1932_v24 = vsel %vm406_vm2, %v1922_v22, -inf }
 0x57c   :  { %v1843_v17 = vpop.f32.mrf.mxu1 }
 0x57d   :  { %v1921_v20 = vsel %vm696_vm12, %v1843_v17, 0.0 }
 0x57e   :  { %v2961_v18 = vpop.f32.mrf.mxu1  ;;  %v1929_v21 = vsel %vm406_vm2, %v1921_v20, -inf }
 0x582   :  { %1487 = vrot.lane.b32.xlu1 %v223_v10, %s3187_s27 }
 0x589   :  { %1485 = vrot.lane.b32.xlu0 %v223_v10, %s3186_s26 }
 0x58d   :  { %1967 = vrot.lane.b32.xlu0 %v223_v10, %s3192_s4 }
 0x5a6   :  { %1930 = vmax.xlane.f32.xlu1 %v1929_v21 }
 0x5aa   :  { %1933 = vmax.xlane.f32.xlu1 %v1932_v24 }
 0x5bb   :  { %1489 = vrot.lane.b32.xlu1 %v223_v10, %s3185_s25 }
 0x5fa   :  { %v1925_v13 = vpop.xlane.xlu1 %1924 }
 0x5fb   :  { %v1935_v27 = vsub.f32 %v1919_v6, %v1925_v13  ;;  %v1352_v6 = vunpack.c.l.s4 %v3194_v5 }
 0x5fc   :  { %v1928_v23 = vpop.xlane.xlu0 %1927 }
 0x5fd   :  { %v1939_v28 = vmul.f32 1.442695, %v1935_v27  ;;  %v1936_v37 = vsub.f32 %v1920_v11, %v1928_v23  ;;  %v1353_v11 = vunpack.c.0.s8 %v1352_v6 }
 0x5fe   :  { %v1488_v25 = vpop.permute.xlu1 %1487 }
 0x5ff   :  { %1971 = vrot.lane.b32.xlu0 %v1488_v25, %s3192_s4  ;;  %3034 = vpow2.f32 %v1939_v28  ;;  %v1941_v39 = vmul.f32 1.442695, %v1936_v37  ;;  %v3471_v10 = vsub.s32 %v1353_v11, %v3331_v38 }
 0x600   :  { %v1486_v26 = vpop.permute.xlu0 %1485 }
 0x601   :  { %1969 = vrot.lane.b32.xlu1 %v1486_v26, %s3192_s4 }
 0x604   :  { %v1968_v47 = vpop.permute.xlu0 %1967 }
 0x60c   :  { %v3035_v29 = vpop.eup %3034 }
 0x60d   :  { %v1947_v44 = vsel %vm406_vm2, %v3035_v29, 0.0 }
 0x61e   :  { %1948 = vadd.xlane.f32.xlu0 %v1947_v44 }
 0x62f   :  { %v1931_v30 = vpop.xlane.xlu1 %1930 }
 0x630   :  { %v1937_v31 = vsub.f32 %v1921_v20, %v1931_v30 }
 0x632   :  { %v1943_v32 = vmul.f32 1.442695, %v1937_v31 }
 0x633   :  { %v1934_v33 = vpop.xlane.xlu1 %1933 }
 0x634   :  { %3036 = vpow2.f32 %v1943_v32  ;;  %v1938_v40 = vsub.f32 %v1922_v22, %v1934_v33 }
 0x635   :  { %3038 = vpow2.f32 %v1941_v39 }
 0x636   :  { %v1945_v41 = vmul.f32 1.442695, %v1938_v40 }
 0x637   :  { %v1490_v34 = vpop.permute.xlu1 %1489 }
 0x638   :  { %1973 = vrot.lane.b32.xlu1 %v1490_v34, %s3192_s4  ;;  %3040 = vpow2.f32 %v1945_v41 }
 0x641   :  { %v3037_v35 = vpop.eup %3036 }
 0x642   :  { %v1953_v36 = vsel %vm406_vm2, %v3037_v35, 0.0  ;;  %v3039_v42 = vpop.eup %3038 }
 0x643   :  { %1954 = vadd.xlane.f32.xlu0 %v1953_v36  ;;  %v1950_v43 = vsel %vm406_vm2, %v3039_v42, 0.0 }
 0x645   :  { %v3041_v45 = vpop.eup %3040 }
 0x646   :  { %v1956_v46 = vsel %vm406_vm2, %v3041_v45, 0.0 }
 0x65c   :  { %1951 = vadd.xlane.f32.xlu1 %v1950_v43 }
 0x660   :  { %1957 = vadd.xlane.f32.xlu1 %v1956_v46 }
 0x670   :  { %1979 = vxpose.xlu0.b32.start.end [1/1] (short) (narrow) %v1968_v47, 8 }
 0x671   :  { %v1972_v48 = vpop.permute.xlu0 %1971 }
 0x673   :  { %v1970_v49 = vpop.permute.xlu1 %1969 }
 0x674   :  { %2043 = vxpose.xlu0.b32.start.end [1/1] (short) (narrow) %v1972_v48, 8 }
 0x693   :  { %2011 = vxpose.xlu1.b32.start.end [1/1] (short) (narrow) %v1970_v49, 8 }
 0x697   :  { %1221 = vxpose.xlu1.b32.start.end [1/1] (short) (narrow) %v3416_v61, 8 }
 0x69b   :  { %1285 = vxpose.xlu1.b32.start.end [1/1] (short) (narrow) %v3422_v2, 8 }
 0x6a7   :  { %v1949_v50 = vpop.xlane.xlu0 %1948 }
 0x6a8   :  { %3042 = vrcp.f32 %v1949_v50 }
 0x6aa   :  { %v1974_v51 = vpop.permute.xlu1 %1973 }
 0x6ab   :  { %2075 = vxpose.xlu0.b32.start.end [1/1] (short) (narrow) %v1974_v51, 8 }
 0x6af   :  { %1189 = vxpose.xlu0.b32.start.end [1/1] (short) (narrow) %v3418_v63, 8 }
 0x6b3   :  { %1253 = vxpose.xlu0.b32.start.end [1/1] (short) (narrow) %v3420_v1, 8 }
 0x6b5   :  { %v3043_v52 = vpop.eup %3042 }
 0x6b6   :  { %v1963_v53 = vmul.f32 %v3043_v52, %v3035_v29 }
 0x6b8   :  { %2968 = vmatpush3.xpose.msk.msra.mxu1 %vm406_vm2, %v1963_v53 }
 0x6b9   :  { %2977 = vmatprep.subr.mxu1 %v3189_v19 }
 0x6cc   :  { %v1955_v54 = vpop.xlane.xlu0 %1954 }
 0x6cd   :  { %3044 = vrcp.f32 %v1955_v54 }
 0x6da   :  { %v3045_v56 = vpop.eup %3044 }
 0x6db   :  { %v1965_v58 = vmul.f32 %v3045_v56, %v3037_v35 }
 0x6e5   :  { %v1952_v55 = vpop.xlane.xlu1 %1951 }
 0x6e6   :  { %3046 = vrcp.f32 %v1952_v55 }
 0x6e9   :  { %v1958_v62 = vpop.xlane.xlu1 %1957 }
 0x6ea   :  { %3048 = vrcp.f32 %v1958_v62 }
 0x6ec   :  { %v1995_v57 = vpop.trf.xlu0 }
 0x6ed   :  { %2970 = vmatmul.mubr.msk.f32.vlgmr.msra.gmra.mxu1 %vm406_vm2, %v1995_v57  ;;  %v2693_v57 = vld [vmem:[#allocation10 + $0x18] sm:$0xff] }
 0x6ee   :  { %2978 = vmatpush3.xpose.msk.msra.mxu1 %vm406_vm2, %v1965_v58  ;;  %2979 = vmatprep.mubr.msk.f32.mxu1 %vm3190_vm1, %v3189_v19  ;;  %v2692_v58 = vld [vmem:[#allocation10 + $0x10] sm:$0xff] }
 0x6ef   :  { %2987 = vmatprep.subr.mxu1 %v2693_v57 }
 0x6f0   :  { %v2059_v59 = vpop.trf.xlu0 }
 0x6f1   :  { %2980 = vmatmul.mubr.msk.f32.vlgmr.msra.gmra.mxu1 %vm406_vm2, %v2059_v59 }
 0x6f2   :  { %2988 = vmatpush3.msra.mxu1 %v2693_v57 }
 0x6f3   :  { %v3047_v60 = vpop.eup %3046  ;;  %2989 = vmatprep.subr.mxu1 %v2692_v58 }
 0x6f4   :  { %v1964_v61 = vmul.f32 %v3047_v60, %v3039_v42  ;;  %2990 = vmatpush3.msra.mxu1 %v2692_v58 }
 0x6f6   :  { %2973 = vmatpush3.xpose.msk.msra.mxu0 %vm406_vm2, %v1964_v61 }
 0x6f7   :  { %2982 = vmatprep.subr.mxu0 %v3189_v19  ;;  %v3049_v63 = vpop.eup %3048 }
 0x6f8   :  { %v1966_v1 = vmul.f32 %v3049_v63, %v3041_v45 }
 0x70f   :  { %v2027_v0 = vpop.trf.xlu1 }
 0x710   :  { %2975 = vmatmul.mubr.msk.f32.vlgmr.msra.gmra.mxu0 %vm406_vm2, %v2027_v0 }
 0x711   :  { %2983 = vmatpush3.xpose.msk.msra.mxu0 %vm406_vm2, %v1966_v1  ;;  %2984 = vmatprep.mubr.msk.f32.mxu0 %vm3190_vm1, %v3189_v19 }
 0x713   :  { %v1237_v8 = vpop.trf.xlu1 }
 0x717   :  { %v1301_v15 = vpop.trf.xlu1 }
 0x718   :  { %v1333_v18 = vcombine.low %v1237_v8, %v1301_v15  ;;  %v1334_v19 = vcombine.high %v1237_v8, %v1301_v15 }
 0x71a   :  { %v1341_v22 = vrot.slane %v1333_v18, %v3468_v12  ;;  %v1348_v24 = vrot.slane %v1334_v19, %v3468_v12 }
 0x727   :  { %v2091_v2 = vpop.trf.xlu0 }
 0x728   :  { %2985 = vmatmul.mubr.msk.f32.vlgmr.msra.gmra.mxu0 %vm406_vm2, %v2091_v2 }
 0x72b   :  { %v1205_v7 = vpop.trf.xlu0 }
 0x72f   :  { %v1269_v14 = vpop.trf.xlu0 }
 0x730   :  { %v1317_v16 = vcombine.low %v1205_v7, %v1269_v14  ;;  %v1318_v17 = vcombine.high %v1205_v7, %v1269_v14 }
 0x732   :  { %v1325_v20 = vrot.slane %v1317_v16, %v3468_v12  ;;  %v1332_v21 = vrot.slane %v1318_v17, %v3468_v12  ;;  %v2691_v16 = vld [vmem:[#allocation10 + $0x8] sm:$0xff]  ;;  %v2690_v17 = vld [vmem:[#allocation10] sm:$0xff] }
 0x733   :  { %2991 = vmatprep.subr.mxu1 %v2691_v16 }
 0x734   :  { %v1349_v13 = vcombine.low %v1325_v20, %v1341_v22  ;;  %v1350_v23 = vcombine.high %v1325_v20, %v1341_v22  ;;  %v1365_v25 = vcombine.low %v1332_v21, %v1348_v24  ;;  %v1366_v26 = vcombine.high %v1332_v21, %v1348_v24  ;;  %2992 = vmatpush3.msra.mxu1 %v2691_v16 }
 0x735   :  { %2993 = vmatprep.subr.mxu1 %v2690_v17 }
 0x736   :  { %v1357_v27 = vrot.slane %v1349_v13, %v3471_v10  ;;  %v1364_v28 = vrot.slane %v1350_v23, %v3471_v10  ;;  %v1373_v29 = vrot.slane %v1365_v25, %v3471_v10  ;;  %v1380_v38 = vrot.slane %v1366_v26, %v3471_v10  ;;  %2994 = vmatpush3.msra.mxu1 %v2690_v17 }
 0x738   :  { %v1385_v44 = vcombine.low %v1357_v27, %v1364_v28  ;;  %v2823_v30 = vcombine.high %v1357_v27, %v1364_v28  ;;  %v1401_v31 = vcombine.low %v1373_v29, %v1380_v38  ;;  %v2824_v32 = vcombine.high %v1373_v29, %v1380_v38 }
 0x73a   :  { %v1392_v33 = vrot.slane %v1385_v44, %v3468_v12  ;;  %v1400_v34 = vrot.slane %v2823_v30, %v3468_v12  ;;  %v1408_v35 = vrot.slane %v1401_v31, %v3468_v12  ;;  %v1416_v36 = vrot.slane %v2824_v32, %v3468_v12 }
 0x73c   :  { %v1417_v37 = vcombine.low %v1392_v33, %v1400_v34  ;;  %v1433_v39 = vcombine.low %v1408_v35, %v1416_v36  ;;  %v1418_v53 = vcombine.high %v1392_v33, %v1400_v34  ;;  %v1434_v54 = vcombine.high %v1408_v35, %v1416_v36 }
 0x73e   :  { %v3486_v40 = vrot.slane %v1417_v37, %v3471_v10  ;;  %v3489_v41 = vrot.slane %v1433_v39, %v3471_v10  ;;  %v1432_v55 = vrot.slane %v1418_v53, %v3471_v10  ;;  %v1448_v56 = vrot.slane %v1434_v54, %v3471_v10 }
 0x740   :  { %v1449_v42 = vcombine.low %v3486_v40, %v3489_v41  ;;  %v1450_v50 = vcombine.high %v3486_v40, %v3489_v41  ;;  %v1451_v59 = vcombine.low %v1432_v55, %v1448_v56  ;;  %v1452_v60 = vcombine.high %v1432_v55, %v1448_v56  ;;  %v2839_v40 = vld [vmem:[%s3541_s6] ss:$0 sm:$0xff] }
 0x7ad   :  { %v2179_v43 = vpop.f32.mrf.mxu1 }
 0x7ae   :  { %2411 = vxpose.xlu0.b32.start.end [1/1] (short) (narrow) %v2179_v43, 8 }
 0x7af   :  { %v2971_v45 = vpop.f32.mrf.mxu1 }
 0x7b1   :  { %v2331_v46 = vpop.f32.mrf.mxu1 }
 0x7b2   :  { %2475 = vxpose.xlu0.b32.start.end [1/1] (short) (narrow) %v2331_v46, 8 }
 0x7b3   :  { %v2981_v47 = vpop.f32.mrf.mxu1 }
 0x7d0   :  { %v2255_v48 = vpop.f32.mrf.mxu0 }
 0x7d1   :  { %2443 = vxpose.xlu1.b32.start.end [1/1] (short) (narrow) %v2255_v48, 8 }
 0x7d2   :  { %v2976_v49 = vpop.f32.mrf.mxu0 }
 0x7db   :  { %1454 = vrot.lane.b32.xlu0 %v1450_v50, %s3181_s30 }
 0x7e8   :  { %v2407_v51 = vpop.f32.mrf.mxu0 }
 0x7e9   :  { %2507 = vxpose.xlu1.b32.start.end [1/1] (short) (narrow) %v2407_v51, 8 }
 0x7ea   :  { %v2986_v52 = vpop.f32.mrf.mxu0 }
 0x807   :  { %1458 = vrot.lane.b32.xlu1 %v1451_v59, %s3195_s8 }
 0x80b   :  { %1462 = vrot.lane.b32.xlu1 %v1452_v60, %s3196_s9 }
 0x82a   :  { %v2427_v61 = vpop.trf.xlu0 }
 0x82e   :  { %v2491_v63 = vpop.trf.xlu0 }
 0x82f   :  { %v2539_v0 = vcombine.low %v2427_v61, %v2491_v63  ;;  %v2540_v1 = vcombine.high %v2427_v61, %v2491_v63 }
 0x831   :  { %v2547_v5 = vrot.slane %v2539_v0, %v3468_v12  ;;  %v2554_v6 = vrot.slane %v2540_v1, %v3468_v12 }
 0x84d   :  { %v2459_v62 = vpop.trf.xlu1 }
 0x865   :  { %v2523_v2 = vpop.trf.xlu1 }
 0x866   :  { %v2555_v3 = vcombine.low %v2459_v62, %v2523_v2  ;;  %v2556_v4 = vcombine.high %v2459_v62, %v2523_v2 }
 0x868   :  { %v2563_v7 = vrot.slane %v2555_v3, %v3468_v12  ;;  %v2570_v8 = vrot.slane %v2556_v4, %v3468_v12 }
 0x86a   :  { %v2571_v9 = vcombine.low %v2547_v5, %v2563_v7  ;;  %v2572_v11 = vcombine.high %v2547_v5, %v2563_v7  ;;  %v2587_v14 = vcombine.low %v2554_v6, %v2570_v8  ;;  %v2588_v15 = vcombine.high %v2554_v6, %v2570_v8 }
 0x86c   :  { %v2579_v18 = vrot.slane %v2571_v9, %v3471_v10  ;;  %v2586_v19 = vrot.slane %v2572_v11, %v3471_v10  ;;  %v2595_v20 = vrot.slane %v2587_v14, %v3471_v10  ;;  %v2602_v21 = vrot.slane %v2588_v15, %v3471_v10 }
 0x86e   :  { %v2607_v22 = vcombine.low %v2579_v18, %v2586_v19  ;;  %v2837_v24 = vcombine.high %v2579_v18, %v2586_v19  ;;  %v2623_v13 = vcombine.low %v2595_v20, %v2602_v21  ;;  %v2838_v23 = vcombine.high %v2595_v20, %v2602_v21 }
 0x870   :  { %v2614_v25 = vrot.slane %v2607_v22, %v3468_v12  ;;  %v2622_v26 = vrot.slane %v2837_v24, %v3468_v12  ;;  %v2630_v27 = vrot.slane %v2623_v13, %v3468_v12  ;;  %v2638_v28 = vrot.slane %v2838_v23, %v3468_v12  ;;  %v1455_v12 = vpop.permute.xlu0 %1454 }
 0x871   :  { %v1465_v45 = vsel %vm406_vm2, %v1449_v42, %v1455_v12 }
 0x872   :  { %v2640_v29 = vcombine.high %v2614_v25, %v2622_v26  ;;  %v2656_v38 = vcombine.high %v2630_v27, %v2638_v28  ;;  %v2639_v44 = vcombine.low %v2614_v25, %v2622_v26  ;;  %v2655_v30 = vcombine.low %v2630_v27, %v2638_v28 }
 0x874   :  { %v2654_v31 = vrot.slane %v2640_v29, %v3471_v10  ;;  %v2670_v32 = vrot.slane %v2656_v38, %v3471_v10  ;;  %v2647_v33 = vrot.slane %v2639_v44, %v3471_v10  ;;  %v2663_v34 = vrot.slane %v2655_v30, %v3471_v10 }
 0x876   :  { %v2673_v35 = vcombine.low %v2654_v31, %v2670_v32  ;;  %v2672_v36 = vcombine.high %v2647_v33, %v2663_v34  ;;  %v2671_v37 = vcombine.low %v2647_v33, %v2663_v34  ;;  %v2674_v43 = vcombine.high %v2654_v31, %v2670_v32 }
 0x878   :  { %2680 = vrot.lane.b32.xlu0 %v2673_v35, %s3195_s8  ;;  %2676 = vrot.lane.b32.xlu1 %v2672_v36, %s3181_s30 }
 0x879   :  { %v1459_v39 = vpop.permute.xlu1 %1458 }
 0x87a   :  { %v1467_v10 = vsel %vm1466_vm13, %v1465_v45, %v1459_v39 }
 0x87c   :  { %2684 = vrot.lane.b32.xlu1 %v2674_v43, %s3196_s9 }
 0x87d   :  { %v1463_v46 = vpop.permute.xlu1 %1462 }
 0x87e   :  { %v1469_v47 = vsel %vm1468_vm14, %v1467_v10, %v1463_v46 }
 0x87f   :  { %2995 = vmatprep.mubr.msk.f32.mxu1 %vm112_vm0, %v1469_v47 }
 0x8ea   :  { %v2677_v48 = vpop.permute.xlu1 %2676  ;;  %v2681_v49 = vpop.permute.xlu0 %2680 }
 0x8eb   :  { %v2687_v50 = vsel %vm406_vm2, %v2671_v37, %v2677_v48 }
 0x8ec   :  { %v2688_v51 = vsel %vm1466_vm13, %v2687_v50, %v2681_v49 }
 0x8ee   :  { %v2685_v52 = vpop.permute.xlu1 %2684 }
 0x8ef   :  { %v2689_v53 = vsel %vm1468_vm14, %v2688_v51, %v2685_v52 }
 0x8f0   :  { %2996 = vmatmul.mubr.msk.f32.vlgmr.msra.gmra.mxu1 %vm112_vm0, %v2689_v53 }
 0x9b0   :  { %v2997_v41 = vpop.f32.mrf.mxu1 }
 0x9b1   :  { %v2779_v42 = vadd.f32 %v2997_v41, %v2839_v40 }
 0x9b2   :  { %v2773_v54 = vpop.f32.mrf.mxu1 }
 0x9b3   :  { %2783 = vst [vmem:[#allocation11 + $0x8] sm:$0xff] %v2779_v42  ;;  %v2774_v55 = vadd.f32 %v2839_v40, %v2773_v54 }
 0x9b5   :  { %2782 = vst [vmem:[#allocation11] sm:$0xff] %v2774_v55 }
 0x9b6   :  { %3161 = shalt.err (!%p3158_p1)
}
 0x9b7   :  { %2795 = dma.vmem_to_hbm [thread:$0]  %s2790_s13, 256, %s3542_s7, [#allocation4], %s3180_s29, %s3180_s29, %s3181_s30  }
 0x9b8   :  { %3176 = dma.done.wait [#allocation4], 256  }
 0x9b9   :  { %3177 = vsyncadd [#allocation4], 4294967040 }
 0x9ba   :  { %2799 = vsyncpa [#allocation3], 1 }
 0x9bb   :  { %2800 = vsyncpa [#allocation6], 1 }
 0x9bc   :  { %2801 = vsyncpa [#allocation9], 1 }
 0x9bd   :  { %2802 = vsyncpa [#allocation4], 1 }

</bundles_post_ra>
